<compile_context>
chip_gen: v7x
topology: tpu7x:2x2x1
jax: 0.10.0
libtpu: 0.0.40
codegen_flags: <defaults>
</compile_context>

<pallas_src>
import functools

import jax
import jax.numpy as jnp
from jax.experimental import pallas as pl
from jax.experimental.pallas import tpu as pltpu


def _rmsnorm_kernel(x_ref, w_ref, o_ref, *, eps):
    # x_ref: (tile_rows, dim), w_ref: (1, dim), o_ref: (tile_rows, dim)
    x32 = x_ref[...].astype(jnp.float32)                  # x.float()
    ms = jnp.mean(x32 * x32, axis=-1, keepdims=True)      # pow(2).mean(-1, keepdim=True)
    normed = x32 * jax.lax.rsqrt(ms + eps)                 # x * rsqrt(... + eps)
    # Match torch exactly: ._norm(x.float()).type_as(x), then * weight.
    out = normed.astype(x_ref.dtype) * w_ref[...]
    o_ref[...] = out.astype(o_ref.dtype)


def _vmem_capacity_bytes():
    """Per-TensorCore VMEM capacity; conservative fallback if query fails."""
    try:
        return int(pltpu.get_tpu_info().vmem_capacity_bytes)
    except Exception:
        return 64 * 1024 * 1024  # v7x per-TC size; safe lower bound everywhere


def _tensorcores_per_chip():
    """2 for megacore chips (v4 / v5p / v7x), 1 for v5e / v6e; 1 on failure."""
    try:
        kind = jax.devices()[0].device_kind.lower()
    except Exception:
        return 1
    if "lite" in kind or "v5e" in kind or "v6" in kind:
        return 1
    if "v4" in kind or "v5" in kind or "v7" in kind:
        return 2
    return 1


def _cdiv(a, b):
    return -(-a // b)


def _round_up(x, m):
    return ((x + m - 1) // m) * m


def _pick_tile_rows(n_rows, dim, in_itemsize, out_itemsize, n_tc):
    """Largest row tile (multiple of 8) whose working set fits the VMEM budget,
    capped by bytes (~8 MiB input block) and by the row count itself."""
    vmem_cap = _vmem_capacity_bytes()
    # Per-row footprint of one grid step:
    #   * input + output blocks, each double-buffered by the auto-pipeline,
    #   * ~2 f32-wide in-kernel temporaries (x32, normed) for sub-32-bit inputs.
    per_row = 2 * dim * (in_itemsize + out_itemsize) + 2 * 4 * dim
    budget = vmem_cap // 2  # headroom for the weight block + compiler scratch
    tile_rows = max(8, (budget // per_row) // 8 * 8)
    # TODO(synk): if dim is so large that even 8 rows exceed the budget, split
    # dim onto a second "arbitrary" grid axis with a two-pass sum + normalize.

    # Bytes-based cap (~8 MiB input block) instead of a fixed row count.
    byte_cap = max(8, ((8 << 20) // max(1, dim * in_itemsize)) // 8 * 8)
    tile_rows = min(tile_rows, byte_cap, _round_up(max(n_rows, 1), 8))

    # Multi-TensorCore chips only: prefer an even (>= 2) step count so the
    # "parallel" row axis splits evenly across cores.  Single-TC chips keep
    # the largest tile (fewest steps) — no artificially forced extra steps.
    if n_tc >= 2 and n_rows > 8:
        steps = _cdiv(n_rows, tile_rows)
        if steps < 2 or steps % 2 != 0:
            target = max(2, steps + (steps % 2))
            for t in (target, target + 2, target + 4, target + 6):
                cand = max(8, _round_up(_cdiv(n_rows, t), 8))
                actual = _cdiv(n_rows, cand)
                if cand <= tile_rows and actual >= 2 and actual % 2 == 0:
                    tile_rows = cand
                    break
    return tile_rows, vmem_cap


def rmsnorm(x, weight, eps=1e-6, *, tile_rows=None):
    """RMSNorm over the last axis of x, scaled by `weight` (shape (dim,))."""
    orig_shape = x.shape
    dim = orig_shape[-1]
    assert weight.shape == (dim,)

    out_dtype = jnp.result_type(x.dtype, weight.dtype)
    x2d = x.reshape(-1, dim)
    n_rows = x2d.shape[0]
    if n_rows == 0:
        return jnp.zeros(orig_shape, out_dtype)

    in_itemsize = jnp.dtype(x.dtype).itemsize
    out_itemsize = jnp.dtype(out_dtype).itemsize
    w_itemsize = jnp.dtype(weight.dtype).itemsize
    n_tc = _tensorcores_per_chip()

    if tile_rows is None:
        tile_rows, vmem_cap = _pick_tile_rows(
            n_rows, dim, in_itemsize, out_itemsize, n_tc)
    else:
        assert tile_rows % 8 == 0, "tile_rows must be a multiple of 8"
        vmem_cap = _vmem_capacity_bytes()

    # No row padding: the grid covers the rows with a possibly-partial last
    # block.  Pallas masks the out-of-bounds rows of that block on writeback,
    # and the per-row computation keeps padded garbage rows fully independent.
    grid = (_cdiv(n_rows, tile_rows),)

    # Scoped-VMEM limit sized to the real working set (incl. f32 temps) with
    # generous headroom, bounded by this generation's physical capacity.
    needed = (tile_rows * dim * (2 * (in_itemsize + out_itemsize) + 2 * 4)
              + 2 * dim * w_itemsize)
    vmem_limit = int(min(max(needed + (8 << 20), 32 << 20), int(vmem_cap * 0.9)))

    w2d = weight.reshape(1, dim)
    kernel = functools.partial(_rmsnorm_kernel, eps=eps)

    out2d = pl.pallas_call(
        kernel,
        out_shape=jax.ShapeDtypeStruct((n_rows, dim), out_dtype),
        grid_spec=pltpu.PrefetchScalarGridSpec(
            num_scalar_prefetch=0,
            grid=grid,
            in_specs=[
                pl.BlockSpec((tile_rows, dim), lambda i: (i, 0)),
                pl.BlockSpec((1, dim), lambda i: (0, 0)),
            ],
            out_specs=pl.BlockSpec((tile_rows, dim), lambda i: (i, 0)),
        ),
        compiler_params=pltpu.CompilerParams(
            dimension_semantics=("parallel",),
            vmem_limit_bytes=vmem_limit,
        ),
    )(x2d, w2d)

    return out2d.reshape(orig_shape)


def rmsnorm_ref(x, weight, eps=1e-6):
    x32 = x.astype(jnp.float32)
    normed = x32 * jax.lax.rsqrt(jnp.mean(x32 * x32, axis=-1, keepdims=True) + eps)
    return normed.astype(x.dtype) * weight


if __name__ == "__main__":
    key = jax.random.PRNGKey(0)

    # Small shapes consistent with the module: batch=2, seq=8, hidden=32.
    batch, seq, hidden = 2, 8, 32
    x = jax.random.normal(key, (batch, seq, hidden), dtype=jnp.float32)
    weight = jnp.ones((hidden,), dtype=jnp.float32)  # torch.ones(dim)

    out = rmsnorm(x, weight, eps=1e-6)
    out = jax.block_until_ready(out)
    ref = rmsnorm_ref(x, weight, eps=1e-6)
    assert out.shape == x.shape and out.dtype == x.dtype
    assert jnp.allclose(out, ref, atol=1e-5, rtol=1e-5)

    # Also exercise the non-divisible row count path (ragged last grid block,
    # no wrapper-side pad/slice).
    key2 = jax.random.PRNGKey(1)
    x2 = jax.random.normal(key2, (3, 5, hidden), dtype=jnp.float32)
    out2 = jax.block_until_ready(rmsnorm(x2, weight, eps=1e-6))
    ref2 = rmsnorm_ref(x2, weight, eps=1e-6)
    assert out2.shape == x2.shape
    assert jnp.allclose(out2, ref2, atol=1e-5, rtol=1e-5)

    print("KERNEL_OK")
</pallas_src>

<mosaic_0001>
module attributes {stable_mosaic.version = 11 : i64} {
  func.func @_rmsnorm_kernel(%arg0: i32, %arg1: memref<16x32xf32, #tpu.memory_space<vmem>>, %arg2: memref<1x32xf32, #tpu.memory_space<vmem>>, %arg3: memref<16x32xf32, #tpu.memory_space<vmem>>) attributes {dimension_semantics = [#tpu.dimension_semantics<parallel>], iteration_bounds = array<i64: 1>, scalar_prefetch = 0 : i64, scratch_operands = 0 : i64, tpu.core_type = #tpu.core_type<tc>, window_params = [{transform_indices = @transform_0, window_bounds = array<i64: 16, 32>}, {pipeline_mode = #tpu.pipeline_mode<synchronous>, transform_indices = @transform_1, window_bounds = array<i64: 1, 32>}, {transform_indices = @transform_2, window_bounds = array<i64: 16, 32>}]} {
    %c0 = arith.constant 0 : index
    %c0_0 = arith.constant 0 : index
    %0 = vector.load %arg1[%c0, %c0_0] : memref<16x32xf32, #tpu.memory_space<vmem>>, vector<16x32xf32>
    %1 = arith.mulf %0, %0 : vector<16x32xf32>
    %cst = arith.constant dense<0.000000e+00> : vector<16xf32>
    %2 = vector.multi_reduction <add>, %1, %cst [1] : vector<16x32xf32> to vector<16xf32>
    %3 = vector.shape_cast %2 : vector<16xf32> to vector<16x1xf32>
    %cst_1 = arith.constant 3.200000e+01 : f32
    %4 = vector.broadcast %cst_1 : f32 to vector<16x1xf32>
    %5 = arith.divf %3, %4 : vector<16x1xf32>
    %cst_2 = arith.constant 9.99999997E-7 : f32
    %6 = vector.broadcast %cst_2 : f32 to vector<16x1xf32>
    %7 = arith.addf %5, %6 : vector<16x1xf32>
    %8 = math.rsqrt %7 : vector<16x1xf32>
    %9 = vector.broadcast %8 : vector<16x1xf32> to vector<16x32xf32>
    %10 = arith.mulf %0, %9 : vector<16x32xf32>
    %c0_3 = arith.constant 0 : index
    %c0_4 = arith.constant 0 : index
    %11 = vector.load %arg2[%c0_3, %c0_4] : memref<1x32xf32, #tpu.memory_space<vmem>>, vector<1x32xf32>
    %12 = vector.broadcast %11 : vector<1x32xf32> to vector<16x32xf32>
    %13 = arith.mulf %10, %12 : vector<16x32xf32>
    %c0_5 = arith.constant 0 : index
    %c0_6 = arith.constant 0 : index
    %14 = vector.load %arg3[%c0_5, %c0_6] : memref<16x32xf32, #tpu.memory_space<vmem>>, vector<16x32xf32>
    tpu.vector_store %arg3[%c0_5, %c0_6], %13 {strides = array<i32>} : memref<16x32xf32, #tpu.memory_space<vmem>>, vector<16x32xf32>,
    return
  }
  func.func @transform_0(%arg0: i32) -> (i32, i32) {
    %c0_i32 = arith.constant 0 : i32
    %c0_i32_0 = arith.constant 0 : i32
    return %arg0, %c0_i32 : i32, i32
  }
  func.func @transform_1(%arg0: i32) -> (i32, i32) {
    %c0_i32 = arith.constant 0 : i32
    %c0_i32_0 = arith.constant 0 : i32
    %c0_i32_1 = arith.constant 0 : i32
    return %c0_i32, %c0_i32_0 : i32, i32
  }
  func.func @transform_2(%arg0: i32) -> (i32, i32) {
    %c0_i32 = arith.constant 0 : i32
    %c0_i32_0 = arith.constant 0 : i32
    return %arg0, %c0_i32 : i32, i32
  }
}

</mosaic_0001>

<bundles_post_ra>
// kernel: tpu_custom_call.1
= control target key start
LH: loop header
LB: loop body
LE: loop exit
PB: predicated region body
PF: predicated region fallthrough
CT: control target
= control target key end

     0   :  { %7 = vsyncpa [#allocation3], 0  ;;  %s187_s0 = inlined_call_operand.hbm [shape: f32[16,32], index: 0, kind: input, shape index: {}]   ;;  %s188_s1 = inlined_call_operand.vmem [shape: f32[1,32], index: 1, kind: input, shape index: {}]   ;;  %s189_s2 = inlined_call_operand.hbm [shape: f32[16,32], index: 2, kind: output, shape index: {}]  }
   0x1   :  { %8 = vsyncpa [#allocation4], 0  ;;  %s131_s9 = smov [#allocation2]   ;;  %s83_s13 = scalar_lea.hbm %s187_s0, 256 }
   0x2   :  { %s14_s10 = sshll.u32 %s131_s9, 4  ;;  %p84_p0 = scmp.ne.s32.totalorder %s187_s0, %s83_s13  ;;  %s15_s10 = int_to_ptr.vmem [resolvable:$true] %s14_s10 }
   0x3   :  { %p87_p1 = scmp.lt.u32.totalorder %s83_s13, %s187_s0 }
   0x5   :  { %p89_p2 = pnand %p87_p1, %p84_p0 }
   0x7   :  { %92 = shalt.err (!%p89_p2)
}
   0x8   :  { %s93_s18 = scalar_lea.vmem %s15_s10, 256  ;;  %p98_p4 = scmp.lt.s32.totalorder %s15_s10, %s15_s10 }
   0x9   :  { %p94_p3 = scmp.ne.s32.totalorder %s15_s10, %s93_s18  ;;  %p99_p5 = scmp.lt.s32.totalorder %s93_s18, %s93_s18 }
   0xb   :  { %p100_p6 = por %p99_p5, %p98_p4 }
   0xd   :  { %p101_p7 = pnand %p100_p6, %p94_p3 }
   0xf   :  { %104 = shalt.err (!%p101_p7)
}
  0x10   :  { %s132_s19 = smov 128   ;;  %s133_s20 = smov 8  }
  0x11   :  { %20 = dma.hbm_to_vmem [thread:$0]  %s187_s0, 256, %s15_s10, [#allocation3], %s132_s19, %s132_s19, %s133_s20  }
  0x12   :  { %127 = dma.done.wait [#allocation3], 256  }
  0x13   :  { %128 = vsyncadd [#allocation3], 4294967040  ;;  %v26_v0 = vld [vmem:[#allocation2] sm:$0xff]  ;;  %vm30_vm0 = vcmask 261120   ;;  %v27_v1 = vld [vmem:[#allocation2 + $0x8] sm:$0xff]  ;;  %s134_s24 = smov [#allocation5]  }
  0x14   :  { %v28_v2 = vmul.f32 %v26_v0, %v26_v0  ;;  %v29_v3 = vmul.f32 %v27_v1, %v27_v1  ;;  %v74_v13 = vld [vmem:[%s188_s1] ss:$0 sm:$0xff]  ;;  %s62_s25 = sshll.u32 %s134_s24, 4  ;;  %s63_s25 = int_to_ptr.vmem [resolvable:$true] %s62_s25 }
  0x15   :  { %s105_s26 = scalar_lea.vmem %s63_s25, 256  ;;  %p110_p9 = scmp.lt.s32.totalorder %s63_s25, %s63_s25 }
  0x16   :  { %v31_v4 = vsel %vm30_vm0, %v28_v2, 0.0  ;;  %v34_v5 = vsel %vm30_vm0, %v29_v3, 0.0  ;;  %p106_p8 = scmp.ne.s32.totalorder %s63_s25, %s105_s26  ;;  %p111_p10 = scmp.lt.s32.totalorder %s105_s26, %s105_s26 }
  0x17   :  { %32 = vadd.xlane.f32.xlu0 %v31_v4 }
  0x18   :  { %p112_p11 = por %p111_p10, %p110_p9 }
  0x1a   :  { %p113_p12 = pnand %p112_p11, %p106_p8 }
  0x1b   :  { %35 = vadd.xlane.f32.xlu0 %v34_v5 }
  0xa4   :  { %v33_v6 = vpop.xlane.xlu0 %32 }
  0xa5   :  { %v38_v7 = vmul.f32 0.03125, %v33_v6 }
  0xa7   :  { %v40_v8 = vadd.f32 1e-06, %v38_v7 }
  0xa8   :  { %v36_v9 = vpop.xlane.xlu0 %35 }
  0xa9   :  { %79 = vrsqrt.f32 %v40_v8  ;;  %v39_v10 = vmul.f32 0.03125, %v36_v9 }
  0xab   :  { %v41_v11 = vadd.f32 1e-06, %v39_v10 }
  0xad   :  { %81 = vrsqrt.f32 %v41_v11 }
  0xb3   :  { %v80_v12 = vpop.eup %79 }
  0xb4   :  { %v44_v14 = vmul.f32 %v80_v12, %v26_v0 }
  0xb6   :  { %v53_v15 = vmul.f32 %v74_v13, %v44_v14 }
  0xb7   :  { %v82_v16 = vpop.eup %81 }
  0xb8   :  { %v45_v17 = vmul.f32 %v82_v16, %v27_v1  ;;  %55 = vst.msk [vmem:[#allocation5] sm:$0xff] %vm30_vm0, %v53_v15 }
  0xba   :  { %v54_v18 = vmul.f32 %v74_v13, %v45_v17 }
  0xbc   :  { %56 = vst.msk [vmem:[#allocation5 + $0x8] sm:$0xff] %vm30_vm0, %v54_v18 }
  0xbd   :  { %116 = shalt.err (!%p113_p12)
}
  0xbe   :  { %s117_s28 = scalar_lea.hbm %s189_s2, 256 }
  0xbf   :  { %p118_p13 = scmp.ne.s32.totalorder %s189_s2, %s117_s28  ;;  %p121_p0 = scmp.lt.u32.totalorder %s117_s28, %s189_s2 }
  0xc1   :  { %p123_p1 = pnand %p121_p0, %p118_p13 }
  0xc3   :  { %126 = shalt.err (!%p123_p1)
}
  0xc4   :  { %68 = dma.vmem_to_hbm [thread:$0]  %s63_s25, 256, %s189_s2, [#allocation4], %s132_s19, %s132_s19, %s133_s20  }
  0xc5   :  { %129 = dma.done.wait [#allocation4], 256  }
  0xc6   :  { %130 = vsyncadd [#allocation4], 4294967040 }
  0xc7   :  { %72 = vsyncpa [#allocation3], 1 }
  0xc8   :  { %73 = vsyncpa [#allocation4], 1 }

</bundles_post_ra>
